<compile_context>
chip_gen: v6e
topology: v6e:2x2x1
jax: 0.10.0
libtpu: 0.0.40
codegen_flags: <defaults>
</compile_context>

<pallas_src>
import jax
import jax.numpy as jnp
from jax.experimental import pallas as pl
from jax.experimental.pallas import tpu as pltpu

IN_FEATURES = 32 * 32 * 3   # 3072
HIDDEN = 100
OUT = 10
LANE = 128                  # lane width / padded feature dim
MAX_TB = 512                # batch-tile cap: fits v5e's scoped VMEM and v7x's 64 MiB/TC


def _round_up(x, m):
    return (x + m - 1) // m * m


def mlp_kernel(x_ref, w1_ref, b1_ref, w2_ref, b2_ref, o_ref):
    # fc1 + ReLU (lane-padded hidden dim = 128). bf16 MXU inputs, f32 accumulation.
    x_bf = x_ref[...].astype(jnp.bfloat16)
    h = jnp.dot(x_bf, w1_ref[...], preferred_element_type=jnp.float32)
    h = jnp.maximum(h + b1_ref[...], 0.0)                  # (TB,128) + (1,128)
    # fc2 + ReLU (lane-padded output dim = 128)
    o = jnp.dot(h.astype(jnp.bfloat16), w2_ref[...],
                preferred_element_type=jnp.float32)
    o_ref[...] = jnp.maximum(o + b2_ref[...], 0.0).astype(o_ref.dtype)


def prepare_params(w1, b1, w2, b2):
    """One-time weight massaging (transpose + lane pad + bf16 cast), out of hot path.

    PyTorch nn.Linear convention in:
      w1: (100, 3072)  b1: (100,)  w2: (10, 100)  b2: (10,)
    Out (zero-padded; exact under ReLU, wrapper slices back to 10 outputs):
      w1t: (3072, 128) bf16   b1r: (1, 128) f32   w2t: (128, 128) bf16   b2r: (1, 128) f32
    """
    w1t = jnp.zeros((IN_FEATURES, LANE), jnp.bfloat16)
    w1t = w1t.at[:, :HIDDEN].set(jnp.transpose(w1).astype(jnp.bfloat16))
    b1r = jnp.zeros((1, LANE), jnp.float32).at[:, :HIDDEN].set(
        b1.astype(jnp.float32)[None, :])
    w2t = jnp.zeros((LANE, LANE), jnp.bfloat16)
    w2t = w2t.at[:HIDDEN, :OUT].set(jnp.transpose(w2).astype(jnp.bfloat16))
    b2r = jnp.zeros((1, LANE), jnp.float32).at[:, :OUT].set(
        b2.astype(jnp.float32)[None, :])
    return w1t, b1r, w2t, b2r


@jax.jit
def very_simple_forward(x_nchw, w1t, b1r, w2t, b2r):
    """x_nchw: (B, 3, 32, 32) f32. Prepared params from prepare_params(). Returns (B, 10)."""
    B = x_nchw.shape[0]
    x2d = x_nchw.reshape(B, -1).astype(jnp.float32)        # (B, 3072)

    # Batch tile: aim for >= 2 grid steps (v7x 2-TC sharding), multiple of 8 (sublane),
    # capped at MAX_TB.  No padding of x: the grid is cdiv and Pallas masks the ragged
    # last block (reads of OOB rows are unspecified but row-independent; OOB output
    # rows are never stored).
    TB = min(MAX_TB, _round_up(max(pl.cdiv(B, 2), 1), 8))
    grid = (pl.cdiv(B, TB),)

    flops = 2 * B * IN_FEATURES * LANE + 2 * B * LANE * LANE
    bytes_accessed = (B * IN_FEATURES * 4                          # x read (f32)
                      + B * LANE * 4                               # out write (f32)
                      + (IN_FEATURES * LANE + LANE * LANE) * 2     # bf16 weights
                      + 2 * LANE * 4)                              # f32 biases

    out = pl.pallas_call(
        mlp_kernel,
        out_shape=jax.ShapeDtypeStruct((B, LANE), jnp.float32),
        grid=grid,
        in_specs=[
            pl.BlockSpec((TB, IN_FEATURES), lambda i: (i, 0)),    # x tile (pipelined)
            pl.BlockSpec((IN_FEATURES, LANE), lambda i: (0, 0)),  # w1t resident (bf16)
            pl.BlockSpec((1, LANE), lambda i: (0, 0)),            # b1 resident
            pl.BlockSpec((LANE, LANE), lambda i: (0, 0)),         # w2t resident (bf16)
            pl.BlockSpec((1, LANE), lambda i: (0, 0)),            # b2 resident
        ],
        out_specs=pl.BlockSpec((TB, LANE), lambda i: (i, 0)),
        compiler_params=pltpu.CompilerParams(
            dimension_semantics=("parallel",),       # shard batch steps across TCs (v7x)
            vmem_limit_bytes=32 << 20,               # raise v5e's 16 MiB default; safe on all gens
        ),
        cost_estimate=pl.CostEstimate(
            flops=flops, transcendentals=0, bytes_accessed=bytes_accessed),
    )(x2d, w1t, b1r, w2t, b2r)

    # Slice back to the module's (B, 10) output. If the consumer can take the padded
    # (B, 128) slab directly, skip this to save a small extra HBM pass.
    return out[:B, :OUT]


def init_params(key):
    """Deterministic synthetic parameters with PyTorch nn.Linear shapes."""
    k1, k2, k3, k4 = jax.random.split(key, 4)
    s1 = 1.0 / jnp.sqrt(IN_FEATURES)
    s2 = 1.0 / jnp.sqrt(HIDDEN)
    w1 = jax.random.uniform(k1, (HIDDEN, IN_FEATURES), jnp.float32, -s1, s1)  # (100, 3072)
    b1 = jax.random.uniform(k2, (HIDDEN,), jnp.float32, -s1, s1)              # (100,)
    w2 = jax.random.uniform(k3, (OUT, HIDDEN), jnp.float32, -s2, s2)          # (10, 100)
    b2 = jax.random.uniform(k4, (OUT,), jnp.float32, -s2, s2)                 # (10,)
    return w1, b1, w2, b2


if __name__ == "__main__":
    key = jax.random.PRNGKey(0)
    kx, kp = jax.random.split(key)
    B = 2
    x = jax.random.normal(kx, (B, 3, 32, 32), jnp.float32)
    w1, b1, w2, b2 = init_params(kp)

    # One-time parameter prep (transpose + lane padding + bf16 cast), outside the hot path.
    w1t, b1r, w2t, b2r = prepare_params(w1, b1, w2, b2)

    out = very_simple_forward(x, w1t, b1r, w2t, b2r)
    out = jax.block_until_ready(out)

    # Sanity check against a pure-JAX f32 reference of the same forward pass.
    # Tolerance relaxed because the kernel uses bf16 MXU inputs (f32 accumulation).
    ref = jnp.maximum(
        jnp.maximum(x.reshape(B, -1) @ w1.T + b1, 0.0) @ w2.T + b2, 0.0
    )
    assert out.shape == (B, OUT)
    assert jnp.allclose(out, ref, atol=2e-2, rtol=2e-2)

    print("KERNEL_OK")
</pallas_src>

<mosaic_0001>
module attributes {stable_mosaic.version = 11 : i64} {
  func.func @mlp_kernel(%arg0: i32, %arg1: memref<8x3072xf32, #tpu.memory_space<vmem>>, %arg2: memref<3072x128xbf16, #tpu.memory_space<vmem>>, %arg3: memref<1x128xf32, #tpu.memory_space<vmem>>, %arg4: memref<128x128xbf16, #tpu.memory_space<vmem>>, %arg5: memref<1x128xf32, #tpu.memory_space<vmem>>, %arg6: memref<8x128xf32, #tpu.memory_space<vmem>>) attributes {dimension_semantics = [#tpu.dimension_semantics<parallel>], iteration_bounds = array<i64: 1>, scalar_prefetch = 0 : i64, scratch_operands = 0 : i64, tpu.core_type = #tpu.core_type<tc>, window_params = [{transform_indices = @transform_0, window_bounds = array<i64: 8, 3072>}, {pipeline_mode = #tpu.pipeline_mode<synchronous>, transform_indices = @transform_1, window_bounds = array<i64: 3072, 128>}, {pipeline_mode = #tpu.pipeline_mode<synchronous>, transform_indices = @transform_2, window_bounds = array<i64: 1, 128>}, {pipeline_mode = #tpu.pipeline_mode<synchronous>, transform_indices = @transform_3, window_bounds = array<i64: 128, 128>}, {pipeline_mode = #tpu.pipeline_mode<synchronous>, transform_indices = @transform_4, window_bounds = array<i64: 1, 128>}, {transform_indices = @transform_5, window_bounds = array<i64: 8, 128>}]} {
    %c0 = arith.constant 0 : index
    %c0_0 = arith.constant 0 : index
    %0 = vector.load %arg1[%c0, %c0_0] : memref<8x3072xf32, #tpu.memory_space<vmem>>, vector<8x3072xf32>
    %1 = arith.truncf %0 : vector<8x3072xf32> to vector<8x3072xbf16>
    %c0_1 = arith.constant 0 : index
    %c0_2 = arith.constant 0 : index
    %2 = vector.load %arg2[%c0_1, %c0_2] : memref<3072x128xbf16, #tpu.memory_space<vmem>>, vector<3072x128xbf16>
    %cst = arith.constant dense<0.000000e+00> : vector<8x128xf32>
    %3 = tpu.matmul %1, %2, %cst {dimension_numbers = #tpu.dot_dimension_numbers<[1], [0], [0], [1], [0, 0, 1, 1], [], []>} : vector<8x3072xbf16>, vector<3072x128xbf16>, vector<8x128xf32> -> vector<8x128xf32>
    %c0_3 = arith.constant 0 : index
    %c0_4 = arith.constant 0 : index
    %4 = vector.load %arg3[%c0_3, %c0_4] : memref<1x128xf32, #tpu.memory_space<vmem>>, vector<1x128xf32>
    %5 = vector.broadcast %4 : vector<1x128xf32> to vector<8x128xf32>
    %6 = arith.addf %3, %5 : vector<8x128xf32>
    %cst_5 = arith.constant 0.000000e+00 : f32
    %7 = vector.broadcast %cst_5 : f32 to vector<8x128xf32>
    %8 = arith.maximumf %6, %7 : vector<8x128xf32>
    %9 = arith.truncf %8 : vector<8x128xf32> to vector<8x128xbf16>
    %c0_6 = arith.constant 0 : index
    %c0_7 = arith.constant 0 : index
    %10 = vector.load %arg4[%c0_6, %c0_7] : memref<128x128xbf16, #tpu.memory_space<vmem>>, vector<128x128xbf16>
    %cst_8 = arith.constant dense<0.000000e+00> : vector<8x128xf32>
    %11 = tpu.matmul %9, %10, %cst_8 {dimension_numbers = #tpu.dot_dimension_numbers<[1], [0], [0], [1], [0, 0, 1, 1], [], []>} : vector<8x128xbf16>, vector<128x128xbf16>, vector<8x128xf32> -> vector<8x128xf32>
    %c0_9 = arith.constant 0 : index
    %c0_10 = arith.constant 0 : index
    %12 = vector.load %arg5[%c0_9, %c0_10] : memref<1x128xf32, #tpu.memory_space<vmem>>, vector<1x128xf32>
    %13 = vector.broadcast %12 : vector<1x128xf32> to vector<8x128xf32>
    %14 = arith.addf %11, %13 : vector<8x128xf32>
    %cst_11 = arith.constant 0.000000e+00 : f32
    %15 = vector.broadcast %cst_11 : f32 to vector<8x128xf32>
    %16 = arith.maximumf %14, %15 : vector<8x128xf32>
    %c0_12 = arith.constant 0 : index
    %c0_13 = arith.constant 0 : index
    %17 = vector.load %arg6[%c0_12, %c0_13] : memref<8x128xf32, #tpu.memory_space<vmem>>, vector<8x128xf32>
    tpu.vector_store %arg6[%c0_12, %c0_13], %16 {strides = array<i32>} : memref<8x128xf32, #tpu.memory_space<vmem>>, vector<8x128xf32>,
    return
  }
  func.func @transform_0(%arg0: i32) -> (i32, i32) {
    %c0_i32 = arith.constant 0 : i32
    %c0_i32_0 = arith.constant 0 : i32
    return %arg0, %c0_i32 : i32, i32
  }
  func.func @transform_1(%arg0: i32) -> (i32, i32) {
    %c0_i32 = arith.constant 0 : i32
    %c0_i32_0 = arith.constant 0 : i32
    %c0_i32_1 = arith.constant 0 : i32
    return %c0_i32, %c0_i32_0 : i32, i32
  }
  func.func @transform_2(%arg0: i32) -> (i32, i32) {
    %c0_i32 = arith.constant 0 : i32
    %c0_i32_0 = arith.constant 0 : i32
    %c0_i32_1 = arith.constant 0 : i32
    return %c0_i32, %c0_i32_0 : i32, i32
  }
  func.func @transform_3(%arg0: i32) -> (i32, i32) {
    %c0_i32 = arith.constant 0 : i32
    %c0_i32_0 = arith.constant 0 : i32
    %c0_i32_1 = arith.constant 0 : i32
    return %c0_i32, %c0_i32_0 : i32, i32
  }
  func.func @transform_4(%arg0: i32) -> (i32, i32) {
    %c0_i32 = arith.constant 0 : i32
    %c0_i32_0 = arith.constant 0 : i32
    %c0_i32_1 = arith.constant 0 : i32
    return %c0_i32, %c0_i32_0 : i32, i32
  }
  func.func @transform_5(%arg0: i32) -> (i32, i32) {
    %c0_i32 = arith.constant 0 : i32
    %c0_i32_0 = arith.constant 0 : i32
    return %arg0, %c0_i32 : i32, i32
  }
}

</mosaic_0001>

<bundles_post_ra>
// kernel: very_simple_forward.1
= control target key start
LH: loop header
LB: loop body
LE: loop exit
PB: predicated region body
PF: predicated region fallthrough
CT: control target
= control target key end

     0   :  { %10 = vsyncpa [#allocation3], 0  ;;  %s3460_s0 = inlined_call_operand.vmem [shape: f32[2,3072], index: 0, kind: input, shape index: {}]   ;;  %s3461_s1 = inlined_call_operand.hbm [shape: bf16[3072,128], index: 1, kind: input, shape index: {}]   ;;  %s3462_s2 = inlined_call_operand.vmem [shape: f32[1,128], index: 2, kind: input, shape index: {}]   ;;  %s3463_s3 = inlined_call_operand.vmem [shape: bf16[128,128], index: 3, kind: input, shape index: {}]   ;;  %s3464_s4 = inlined_call_operand.vmem [shape: f32[1,128], index: 4, kind: input, shape index: {}]   ;;  %s3465_s5 = inlined_call_operand.hbm [shape: f32[2,128], index: 5, kind: output, shape index: {}]  }
   0x1   :  { %11 = vsyncpa [#allocation4], 0  ;;  %s3287_s18 = smov [#allocation2]  }
   0x2   :  { %s19_s19 = sshll.u32 %s3287_s18, 4  ;;  %s20_s19 = int_to_ptr.vmem [resolvable:$true] %s19_s19 }
   0x3   :  { %s3251_s20 = scalar_lea.vmem %s20_s19, 24576  ;;  %p3256_p1 = scmp.lt.s32.totalorder %s20_s19, %s20_s19 }
   0x4   :  { %p3252_p0 = scmp.ne.s32.totalorder %s20_s19, %s3251_s20  ;;  %p3257_p2 = scmp.lt.s32.totalorder %s3251_s20, %s3251_s20 }
   0x6   :  { %p3258_p3 = por %p3257_p2, %p3256_p1 }
   0x8   :  { %p3259_p4 = pnand %p3258_p3, %p3252_p0 }
   0xa   :  { %3262 = shalt.err (!%p3259_p4)
}
   0xb   :  { %s3288_s21 = smov 64   ;;  %s3289_s22 = smov 4  }
   0xc   :  { %25 = dma.hbm_to_vmem [thread:$0]  %s3461_s1, 24576, %s20_s19, [#allocation3], %s3288_s21, %s3288_s21, %s3289_s22  }
   0xd   :  { %3283 = dma.done.wait [#allocation3], 24576  }
   0xe   :  { %3284 = vsyncadd [#allocation3], 4294942720  ;;  %v3007_v0 = vld [vmem:[#allocation2 + $0x78] sm:$0xff]   ;;  %v3011_v4 = vld [vmem:[#allocation2 + $0x70] sm:$0xff]   ;;  %v3290_v24 = vmov 1983009808   ;;  %v91_v26 = vlaneseq }
   0xf   :  { %v3008_v1 = vld [vmem:[#allocation2 + $0xf8] sm:$0xff]   ;;  %2705 = vmatprep.subr.bf16.mxu0 %v3007_v0  ;;  %v3012_v5 = vld [vmem:[#allocation2 + $0xf0] sm:$0xff]   ;;  %v3015_v8 = vld [vmem:[#allocation2 + $0x68] sm:$0xff]   ;;  %v89_v25 = vunpack.c.l.s4 %v3290_v24  ;;  %vm3292_vm0 = vmmov 0  }
  0x10   :  { %v3009_v2 = vld [vmem:[#allocation2 + $0x38] sm:$0xff]   ;;  %2727 = vmatprep.subr.bf16.mxu1 %v3008_v1  ;;  %v3013_v6 = vld [vmem:[#allocation2 + $0x30] sm:$0xff]   ;;  %v3016_v9 = vld [vmem:[#allocation2 + $0xe8] sm:$0xff]   ;;  %v92_v32 = vshrl.u32 %v91_v26, 7 }
  0x11   :  { %v3010_v3 = vld [vmem:[#allocation2 + $0xb8] sm:$0xff]   ;;  %2706 = vmatpush3.bf16.msra.mxu0 %v3009_v2  ;;  %v3014_v7 = vld [vmem:[#allocation2 + $0xb0] sm:$0xff]   ;;  %v3017_v10 = vld [vmem:[#allocation2 + $0x28] sm:$0xff]   ;;  %v90_v31 = vunpack.c.0.s8 %v89_v25 }
  0x12   :  { %2728 = vmatpush3.bf16.msra.mxu1 %v3010_v3  ;;  %2707 = vmatprep.subr.bf16.mxu0 %v3011_v4  ;;  %v3018_v11 = vld [vmem:[#allocation2 + $0xa8] sm:$0xff]   ;;  %v3019_v12 = vld [vmem:[#allocation2 + $0x60] sm:$0xff]   ;;  %v3023_v16 = vld [vmem:[#allocation2 + $0x58] sm:$0xff]  }
  0x13   :  { %2729 = vmatprep.subr.bf16.mxu1 %v3012_v5  ;;  %v3020_v13 = vld [vmem:[#allocation2 + $0xe0] sm:$0xff]   ;;  %v3024_v17 = vld [vmem:[#allocation2 + $0xd8] sm:$0xff]   ;;  %v3027_v20 = vld [vmem:[#allocation2 + $0x50] sm:$0xff]   ;;  %v3329_v37 = vsub.s32 %v90_v31, %v92_v32 }
  0x14   :  { %v3021_v14 = vld [vmem:[#allocation2 + $0x20] sm:$0xff]   ;;  %v3025_v18 = vld [vmem:[#allocation2 + $0x18] sm:$0xff]   ;;  %v3028_v21 = vld [vmem:[#allocation2 + $0xd0] sm:$0xff]  }
  0x15   :  { %2708 = vmatpush3.bf16.msra.mxu0 %v3013_v6  ;;  %v3022_v15 = vld [vmem:[#allocation2 + $0xa0] sm:$0xff]   ;;  %v3026_v19 = vld [vmem:[#allocation2 + $0x98] sm:$0xff]   ;;  %v3029_v22 = vld [vmem:[#allocation2 + $0x10] sm:$0xff]  }
  0x16   :  { %2730 = vmatpush3.bf16.msra.mxu1 %v3014_v7  ;;  %2709 = vmatprep.subr.bf16.mxu0 %v3015_v8  ;;  %v3030_v23 = vld [vmem:[#allocation2 + $0x90] sm:$0xff]   ;;  %v3031_v27 = vld [vmem:[#allocation2 + $0x48] sm:$0xff]   ;;  %v3035_v33 = vld [vmem:[#allocation2 + $0x40] sm:$0xff]  }
  0x17   :  { %2731 = vmatprep.subr.bf16.mxu1 %v3016_v9  ;;  %v3032_v28 = vld [vmem:[#allocation2 + $0xc8] sm:$0xff]   ;;  %v3036_v34 = vld [vmem:[#allocation2 + $0xc0] sm:$0xff]   ;;  %v3045_v44 = vld [vmem:[#allocation2 + $0x178] sm:$0xff]  }
  0x18   :  { %v3033_v29 = vld [vmem:[#allocation2 + $0x8] sm:$0xff]   ;;  %v3037_v35 = vld [vmem:[#allocation2] sm:$0xff]   ;;  %v3046_v47 = vld [vmem:[#allocation2 + $0x1f8] sm:$0xff]  }
  0x19   :  { %2710 = vmatpush3.bf16.msra.mxu0 %v3017_v10  ;;  %v3034_v30 = vld [vmem:[#allocation2 + $0x88] sm:$0xff]   ;;  %v3038_v36 = vld [vmem:[#allocation2 + $0x80] sm:$0xff]   ;;  %v3047_v50 = vld [vmem:[#allocation2 + $0x138] sm:$0xff]  }
  0x1a   :  { %2732 = vmatpush3.bf16.msra.mxu1 %v3018_v11  ;;  %2711 = vmatprep.subr.bf16.mxu0 %v3019_v12  ;;  %v3039_v38 = vld [vmem:[%s3460_s0] ss:$48 sps:$4 sm:$0xff]   ;;  %v3043_v40 = vld [vmem:[%s3460_s0 + $0x4] ss:$48 sps:$4 sm:$0xff]   ;;  %v3048_v53 = vld [vmem:[#allocation2 + $0x1b8] sm:$0xff]  }
  0x1b   :  { %2733 = vmatprep.subr.bf16.mxu1 %v3020_v13  ;;  %v3041_v39 = vld [vmem:[%s3460_s0 + $0x60] ss:$48 sps:$4 sm:$0xff]   ;;  %v3044_v41 = vld [vmem:[%s3460_s0 + $0x64] ss:$48 sps:$4 sm:$0xff]   ;;  %v94_v42 = vrot.slane %v3039_v38, %v3329_v37  ;;  %v101_v45 = vrot.slane %v3043_v40, %v3329_v37  ;;  %v3053_v62 = vld [vmem:[#allocation2 + $0x168] sm:$0xff]  }
  0x1c   :  { %v108_v43 = vrot.slane %v3041_v39, %v3329_v37  ;;  %v115_v46 = vrot.slane %v3044_v41, %v3329_v37  ;;  %v3049_v56 = vld [vmem:[#allocation2 + $0x170] sm:$0xff]   ;;  %v3054_v63 = vld [vmem:[#allocation2 + $0x1e8] sm:$0xff]   ;;  %v3057_v2 = vld [vmem:[#allocation2 + $0x160] sm:$0xff]  }
  0x1d   :  { %2712 = vmatpush3.bf16.msra.mxu0 %v3021_v14  ;;  %v3050_v59 = vld [vmem:[#allocation2 + $0x1f0] sm:$0xff]   ;;  %v3055_v0 = vld [vmem:[#allocation2 + $0x128] sm:$0xff]   ;;  %v3058_v3 = vld [vmem:[#allocation2 + $0x1e0] sm:$0xff]  }
  0x1e   :  { %2734 = vmatpush3.bf16.msra.mxu1 %v3022_v15  ;;  %2713 = vmatprep.subr.bf16.mxu0 %v3023_v16  ;;  %v117_v48 = vcombine.high %v94_v42, %v108_v43  ;;  %v116_v49 = vcombine.low %v94_v42, %v108_v43  ;;  %v119_v51 = vcombine.high %v101_v45, %v115_v46  ;;  %v3051_v60 = vld [vmem:[#allocation2 + $0x130] sm:$0xff]   ;;  %v3056_v1 = vld [vmem:[#allocation2 + $0x1a8] sm:$0xff]   ;;  %v3059_v4 = vld [vmem:[#allocation2 + $0x120] sm:$0xff]  }
  0x1f   :  { %2735 = vmatprep.subr.bf16.mxu1 %v3024_v17  ;;  %v118_v52 = vcombine.low %v101_v45, %v115_v46  ;;  %v3052_v61 = vld [vmem:[#allocation2 + $0x1b0] sm:$0xff]   ;;  %v3060_v5 = vld [vmem:[#allocation2 + $0x1a0] sm:$0xff]   ;;  %v3061_v6 = vld [vmem:[#allocation2 + $0x158] sm:$0xff]  }
  0x20   :  { %v325_v54 = vpack.c.bf16 %v117_v48, %v117_v48  ;;  %v324_v55 = vpack.c.bf16 %v116_v49, %v116_v49  ;;  %v327_v57 = vpack.c.bf16 %v119_v51, %v119_v51  ;;  %v3062_v7 = vld [vmem:[#allocation2 + $0x1d8] sm:$0xff]   ;;  %v3065_v10 = vld [vmem:[#allocation2 + $0x150] sm:$0xff]   ;;  %v3069_v14 = vld [vmem:[#allocation2 + $0x148] sm:$0xff]  }
  0x21   :  { %2714 = vmatpush3.bf16.msra.mxu0 %v3025_v18  ;;  %v326_v58 = vpack.c.bf16 %v118_v52, %v118_v52  ;;  %v3063_v8 = vld [vmem:[#allocation2 + $0x118] sm:$0xff]   ;;  %v3066_v11 = vld [vmem:[#allocation2 + $0x1d0] sm:$0xff]   ;;  %v3070_v15 = vld [vmem:[#allocation2 + $0x1c8] sm:$0xff]  }
  0x22   :  { %2736 = vmatpush3.bf16.msra.mxu1 %v3026_v19  ;;  %2715 = vmatprep.subr.bf16.mxu0 %v3027_v20  ;;  %v3064_v9 = vld [vmem:[#allocation2 + $0x198] sm:$0xff]   ;;  %v3067_v12 = vld [vmem:[#allocation2 + $0x110] sm:$0xff]   ;;  %v3071_v16 = vld [vmem:[#allocation2 + $0x108] sm:$0xff]  }
  0x23   :  { %2737 = vmatprep.subr.bf16.mxu1 %v3028_v21  ;;  %1923 = vmatprep.mubr.bf16.mxu0 %v325_v54  ;;  %v3068_v13 = vld [vmem:[#allocation2 + $0x190] sm:$0xff]   ;;  %v3072_v17 = vld [vmem:[#allocation2 + $0x188] sm:$0xff]   ;;  %v3073_v18 = vld [vmem:[#allocation2 + $0x140] sm:$0xff]  }
  0x24   :  { %1963 = vmatprep.mubr.bf16.mxu1 %v327_v57  ;;  %v3074_v19 = vld [vmem:[#allocation2 + $0x1c0] sm:$0xff]   ;;  %v3081_v24 = vld [vmem:[%s3460_s0 + $0xc] ss:$48 sps:$4 sm:$0xff]   ;;  %v3087_v41 = vld [vmem:[#allocation2 + $0x270] sm:$0xff]  }
  0x25   :  { %2716 = vmatpush3.bf16.msra.mxu0 %v3029_v22  ;;  %v3075_v20 = vld [vmem:[#allocation2 + $0x100] sm:$0xff]   ;;  %v3077_v22 = vld [vmem:[%s3460_s0 + $0x8] ss:$48 sps:$4 sm:$0xff]   ;;  %v3082_v25 = vld [vmem:[%s3460_s0 + $0x6c] ss:$48 sps:$4 sm:$0xff]  }
  0x26   :  { %2738 = vmatpush3.bf16.msra.mxu1 %v3030_v23  ;;  %2717 = vmatprep.subr.bf16.mxu0 %v3031_v27  ;;  %v3076_v21 = vld [vmem:[#allocation2 + $0x180] sm:$0xff]   ;;  %v3079_v23 = vld [vmem:[%s3460_s0 + $0x68] ss:$48 sps:$4 sm:$0xff]   ;;  %v130_v26 = vrot.slane %v3077_v22, %v3329_v37  ;;  %v3089_v45 = vld [vmem:[#allocation2 + $0x230] sm:$0xff]  }
  0x27   :  { %2739 = vmatprep.subr.bf16.mxu1 %v3032_v28  ;;  %v144_v27 = vrot.slane %v3079_v23, %v3329_v37  ;;  %v137_v28 = vrot.slane %v3081_v24, %v3329_v37  ;;  %v3084_v31 = vld [vmem:[#allocation2 + $0x2f8] sm:$0xff]   ;;  %v3090_v46 = vld [vmem:[#allocation2 + $0x2b0] sm:$0xff]   ;;  %v3092_v48 = vld [vmem:[#allocation2 + $0x2e8] sm:$0xff]  }
  0x28   :  { %v3086_v38 = vld [vmem:[#allocation2 + $0x2b8] sm:$0xff]   ;;  %v3093_v49 = vld [vmem:[#allocation2 + $0x228] sm:$0xff]   ;;  %v3095_v51 = vld [vmem:[#allocation2 + $0x260] sm:$0xff]  }
  0x29   :  { %2718 = vmatpush3.bf16.msra.mxu0 %v3033_v29  ;;  %v3083_v29 = vld [vmem:[#allocation2 + $0x278] sm:$0xff]   ;;  %v153_v32 = vcombine.high %v130_v26, %v144_v27  ;;  %v3096_v52 = vld [vmem:[#allocation2 + $0x2e0] sm:$0xff]  }
  0x2a   :  { %2740 = vmatpush3.bf16.msra.mxu1 %v3034_v30  ;;  %2719 = vmatprep.subr.bf16.mxu0 %v3035_v33  ;;  %v151_v30 = vrot.slane %v3082_v25, %v3329_v37  ;;  %v152_v33 = vcombine.low %v130_v26, %v144_v27  ;;  %v3098_v54 = vld [vmem:[#allocation2 + $0x2a0] sm:$0xff]   ;;  %v3101_v57 = vld [vmem:[#allocation2 + $0x218] sm:$0xff]   ;;  %v3125_v27 = vld [vmem:[#allocation2 + $0x370] sm:$0xff]  }
  0x2b   :  { %2741 = vmatprep.subr.bf16.mxu1 %v3036_v34  ;;  %v3085_v34 = vld [vmem:[#allocation2 + $0x238] sm:$0xff]   ;;  %v329_v39 = vpack.c.bf16 %v153_v32, %v153_v32  ;;  %v3130_v32 = vld [vmem:[#allocation2 + $0x3e8] sm:$0xff]  }
  0x2c   :  { %v328_v40 = vpack.c.bf16 %v152_v33, %v152_v33  ;;  %v3124_v22 = vld [vmem:[#allocation2 + $0x3b8] sm:$0xff]   ;;  %v3131_v33 = vld [vmem:[#allocation2 + $0x328] sm:$0xff]  }
  0x2d   :  { %2720 = vmatpush3.bf16.msra.mxu0 %v3037_v35  ;;  %v155_v35 = vcombine.high %v137_v28, %v151_v30 }
  0x2e   :  { %2742 = vmatpush3.bf16.msra.mxu1 %v3038_v36  ;;  %2749 = vmatprep.subr.bf16.mxu0 %v3045_v44  ;;  %v154_v36 = vcombine.low %v137_v28, %v151_v30  ;;  %v3088_v44 = vld [vmem:[#allocation2 + $0x2f0] sm:$0xff]  }
  0x2f   :  { %2771 = vmatprep.subr.bf16.mxu1 %v3046_v47  ;;  %v331_v42 = vpack.c.bf16 %v155_v35, %v155_v35  ;;  %v3091_v47 = vld [vmem:[#allocation2 + $0x268] sm:$0xff]   ;;  %v3126_v28 = vld [vmem:[#allocation2 + $0x3f0] sm:$0xff]   ;;  %v3133_v35 = vld [vmem:[#allocation2 + $0x360] sm:$0xff]  }
  0x30   :  { %1924 = vmatmul.mubr.bf16.vlgmr.msra.gmra.mxu0 %v324_v55  ;;  %v330_v43 = vpack.c.bf16 %v154_v36, %v154_v36  ;;  %v3099_v55 = vld [vmem:[#allocation2 + $0x258] sm:$0xff]   ;;  %v3128_v30 = vld [vmem:[#allocation2 + $0x3b0] sm:$0xff]   ;;  %v3134_v36 = vld [vmem:[#allocation2 + $0x3e0] sm:$0xff]  }
  0x31   :  { %1964 = vmatmul.mubr.bf16.vlgmr.msra.gmra.mxu1 %v326_v58  ;;  %2750 = vmatpush3.bf16.msra.mxu0 %v3047_v50  ;;  %v3094_v50 = vld [vmem:[#allocation2 + $0x2a8] sm:$0xff]   ;;  %v3102_v58 = vld [vmem:[#allocation2 + $0x298] sm:$0xff]  }
  0x32   :  { %2772 = vmatpush3.bf16.msra.mxu1 %v3048_v53  ;;  %2751 = vmatprep.subr.bf16.mxu0 %v3049_v56  ;;  %v3097_v53 = vld [vmem:[#allocation2 + $0x220] sm:$0xff]   ;;  %v3100_v56 = vld [vmem:[#allocation2 + $0x2d8] sm:$0xff]  }
  0x33   :  { %2773 = vmatprep.subr.bf16.mxu1 %v3050_v59  ;;  %2003 = vmatprep.mubr.bf16.mxu0 %v329_v39  ;;  %v3103_v59 = vld [vmem:[#allocation2 + $0x250] sm:$0xff]   ;;  %v3136_v39 = vld [vmem:[#allocation2 + $0x3a0] sm:$0xff]  }
  0x34   :  { %2043 = vmatprep.mubr.bf16.mxu1 %v331_v42  ;;  %v3139_v42 = vld [vmem:[#allocation2 + $0x318] sm:$0xff]  }
  0x35   :  { %2752 = vmatpush3.bf16.msra.mxu0 %v3051_v60  ;;  %v3104_v60 = vld [vmem:[#allocation2 + $0x2d0] sm:$0xff]  }
  0x36   :  { %2774 = vmatpush3.bf16.msra.mxu1 %v3052_v61  ;;  %2753 = vmatprep.subr.bf16.mxu0 %v3053_v62  ;;  %v3105_v61 = vld [vmem:[#allocation2 + $0x210] sm:$0xff]  }
  0x37   :  { %2775 = vmatprep.subr.bf16.mxu1 %v3054_v63  ;;  %v3106_v62 = vld [vmem:[#allocation2 + $0x290] sm:$0xff]   ;;  %v3107_v63 = vld [vmem:[#allocation2 + $0x248] sm:$0xff]  }
  0x39   :  { %2754 = vmatpush3.bf16.msra.mxu0 %v3055_v0  ;;  %v3108_v0 = vld [vmem:[#allocation2 + $0x2c8] sm:$0xff]  }
  0x3a   :  { %2776 = vmatpush3.bf16.msra.mxu1 %v3056_v1  ;;  %2755 = vmatprep.subr.bf16.mxu0 %v3057_v2  ;;  %v3109_v1 = vld [vmem:[#allocation2 + $0x208] sm:$0xff]  }
  0x3b   :  { %2777 = vmatprep.subr.bf16.mxu1 %v3058_v3  ;;  %v3110_v2 = vld [vmem:[#allocation2 + $0x288] sm:$0xff]   ;;  %v3111_v3 = vld [vmem:[#allocation2 + $0x240] sm:$0xff]  }
  0x3d   :  { %2756 = vmatpush3.bf16.msra.mxu0 %v3059_v4  ;;  %v3112_v4 = vld [vmem:[#allocation2 + $0x2c0] sm:$0xff]  }
  0x3e   :  { %2778 = vmatpush3.bf16.msra.mxu1 %v3060_v5  ;;  %2757 = vmatprep.subr.bf16.mxu0 %v3061_v6  ;;  %v3113_v5 = vld [vmem:[#allocation2 + $0x200] sm:$0xff]  }
  0x3f   :  { %2779 = vmatprep.subr.bf16.mxu1 %v3062_v7  ;;  %v3114_v6 = vld [vmem:[#allocation2 + $0x280] sm:$0xff]  }
  0x40   :  { %v3115_v7 = vld [vmem:[%s3460_s0 + $0x10] ss:$48 sps:$4 sm:$0xff]  }
  0x41   :  { %2758 = vmatpush3.bf16.msra.mxu0 %v3063_v8  ;;  %v3117_v8 = vld [vmem:[%s3460_s0 + $0x70] ss:$48 sps:$4 sm:$0xff]  }
  0x42   :  { %2780 = vmatpush3.bf16.msra.mxu1 %v3064_v9  ;;  %2759 = vmatprep.subr.bf16.mxu0 %v3065_v10  ;;  %v3119_v9 = vld [vmem:[%s3460_s0 + $0x14] ss:$48 sps:$4 sm:$0xff]  }
  0x43   :  { %2781 = vmatprep.subr.bf16.mxu1 %v3066_v11  ;;  %v3120_v10 = vld [vmem:[%s3460_s0 + $0x74] ss:$48 sps:$4 sm:$0xff]   ;;  %v166_v11 = vrot.slane %v3115_v7, %v3329_v37  ;;  %v3162_v7 = vld [vmem:[#allocation2 + $0x4b8] sm:$0xff]  }
  0x45   :  { %2760 = vmatpush3.bf16.msra.mxu0 %v3067_v12  ;;  %v3121_v12 = vld [vmem:[#allocation2 + $0x378] sm:$0xff]  }
  0x46   :  { %2782 = vmatpush3.bf16.msra.mxu1 %v3068_v13  ;;  %2761 = vmatprep.subr.bf16.mxu0 %v3069_v14  ;;  %v180_v13 = vrot.slane %v3117_v8, %v3329_v37  ;;  %v173_v14 = vrot.slane %v3119_v9, %v3329_v37 }
  0x47   :  { %2783 = vmatprep.subr.bf16.mxu1 %v3070_v15  ;;  %v187_v15 = vrot.slane %v3120_v10, %v3329_v37  ;;  %v3163_v10 = vld [vmem:[#allocation2 + $0x470] sm:$0xff]  }
  0x49   :  { %2762 = vmatpush3.bf16.msra.mxu0 %v3071_v16  ;;  %v3122_v16 = vld [vmem:[#allocation2 + $0x3f8] sm:$0xff]  }
  0x4a   :  { %2784 = vmatpush3.bf16.msra.mxu1 %v3072_v17  ;;  %2763 = vmatprep.subr.bf16.mxu0 %v3073_v18  ;;  %v189_v17 = vcombine.high %v166_v11, %v180_v13  ;;  %v191_v18 = vcombine.high %v173_v14, %v187_v15 }
  0x4b   :  { %2785 = vmatprep.subr.bf16.mxu1 %v3074_v19  ;;  %v188_v19 = vcombine.low %v166_v11, %v180_v13  ;;  %v3164_v13 = vld [vmem:[#allocation2 + $0x4f0] sm:$0xff]  }
  0x4c   :  { %v333_v23 = vpack.c.bf16 %v189_v17, %v189_v17  ;;  %v335_v24 = vpack.c.bf16 %v191_v18, %v191_v18  ;;  %v3168_v17 = vld [vmem:[#allocation2 + $0x4e8] sm:$0xff]  }
  0x4d   :  { %2764 = vmatpush3.bf16.msra.mxu0 %v3075_v20  ;;  %v190_v20 = vcombine.low %v173_v14, %v187_v15  ;;  %v332_v25 = vpack.c.bf16 %v188_v19, %v188_v19  ;;  %v3165_v14 = vld [vmem:[#allocation2 + $0x430] sm:$0xff]   ;;  %v3169_v18 = vld [vmem:[#allocation2 + $0x428] sm:$0xff]  }
  0x4e   :  { %2786 = vmatpush3.bf16.msra.mxu1 %v3076_v21  ;;  %2793 = vmatprep.subr.bf16.mxu0 %v3083_v29  ;;  %v3123_v21 = vld [vmem:[#allocation2 + $0x338] sm:$0xff]   ;;  %v3127_v29 = vld [vmem:[#allocation2 + $0x330] sm:$0xff]   ;;  %v3170_v19 = vld [vmem:[#allocation2 + $0x4a8] sm:$0xff]  }
  0x4f   :  { %2815 = vmatprep.subr.bf16.mxu1 %v3084_v31  ;;  %v334_v26 = vpack.c.bf16 %v190_v20, %v190_v20  ;;  %v3129_v31 = vld [vmem:[#allocation2 + $0x368] sm:$0xff]   ;;  %v3166_v15 = vld [vmem:[#allocation2 + $0x4b0] sm:$0xff]   ;;  %v3171_v20 = vld [vmem:[#allocation2 + $0x460] sm:$0xff]  }
  0x50   :  { %2004 = vmatmul.mubr.bf16.vlgmr.msra.gmra.mxu0 %v328_v40  ;;  %v3137_v40 = vld [vmem:[#allocation2 + $0x358] sm:$0xff]  }
  0x51   :  { %2044 = vmatmul.mubr.bf16.vlgmr.msra.gmra.mxu1 %v330_v43  ;;  %2794 = vmatpush3.bf16.msra.mxu0 %v3085_v34  ;;  %v3132_v34 = vld [vmem:[#allocation2 + $0x3a8] sm:$0xff]   ;;  %v3140_v43 = vld [vmem:[#allocation2 + $0x398] sm:$0xff]  }
  0x52   :  { %2816 = vmatpush3.bf16.msra.mxu1 %v3086_v38  ;;  %2795 = vmatprep.subr.bf16.mxu0 %v3087_v41  ;;  %v3135_v38 = vld [vmem:[#allocation2 + $0x320] sm:$0xff]   ;;  %v3138_v41 = vld [vmem:[#allocation2 + $0x3d8] sm:$0xff]  }
  0x53   :  { %2817 = vmatprep.subr.bf16.mxu1 %v3088_v44  ;;  %2083 = vmatprep.mubr.bf16.mxu0 %v333_v23  ;;  %v3141_v44 = vld [vmem:[#allocation2 + $0x350] sm:$0xff]   ;;  %v3174_v23 = vld [vmem:[#allocation2 + $0x4a0] sm:$0xff]  }
  0x54   :  { %2123 = vmatprep.mubr.bf16.mxu1 %v335_v24  ;;  %v3175_v24 = vld [vmem:[#allocation2 + $0x458] sm:$0xff]  }
  0x55   :  { %2796 = vmatpush3.bf16.msra.mxu0 %v3089_v45  ;;  %v3142_v45 = vld [vmem:[#allocation2 + $0x3d0] sm:$0xff]  }
  0x56   :  { %2818 = vmatpush3.bf16.msra.mxu1 %v3090_v46  ;;  %2797 = vmatprep.subr.bf16.mxu0 %v3091_v47  ;;  %v3143_v46 = vld [vmem:[#allocation2 + $0x310] sm:$0xff]  }
  0x57   :  { %2819 = vmatprep.subr.bf16.mxu1 %v3092_v48  ;;  %v3144_v47 = vld [vmem:[#allocation2 + $0x390] sm:$0xff]   ;;  %v3145_v48 = vld [vmem:[#allocation2 + $0x348] sm:$0xff]  }
  0x59   :  { %2798 = vmatpush3.bf16.msra.mxu0 %v3093_v49  ;;  %v3146_v49 = vld [vmem:[#allocation2 + $0x3c8] sm:$0xff]  }
  0x5a   :  { %2820 = vmatpush3.bf16.msra.mxu1 %v3094_v50  ;;  %2799 = vmatprep.subr.bf16.mxu0 %v3095_v51  ;;  %v3147_v50 = vld [vmem:[#allocation2 + $0x308] sm:$0xff]  }
  0x5b   :  { %2821 = vmatprep.subr.bf16.mxu1 %v3096_v52  ;;  %v3148_v51 = vld [vmem:[#allocation2 + $0x388] sm:$0xff]   ;;  %v3149_v52 = vld [vmem:[#allocation2 + $0x340] sm:$0xff]  }
  0x5d   :  { %2800 = vmatpush3.bf16.msra.mxu0 %v3097_v53  ;;  %v3150_v53 = vld [vmem:[#allocation2 + $0x3c0] sm:$0xff]  }
  0x5e   :  { %2822 = vmatpush3.bf16.msra.mxu1 %v3098_v54  ;;  %2801 = vmatprep.subr.bf16.mxu0 %v3099_v55  ;;  %v3151_v54 = vld [vmem:[#allocation2 + $0x300] sm:$0xff]  }
  0x5f   :  { %2823 = vmatprep.subr.bf16.mxu1 %v3100_v56  ;;  %v3152_v55 = vld [vmem:[#allocation2 + $0x380] sm:$0xff]   ;;  %v3153_v56 = vld [vmem:[%s3460_s0 + $0x18] ss:$48 sps:$4 sm:$0xff]  }
  0x61   :  { %2802 = vmatpush3.bf16.msra.mxu0 %v3101_v57  ;;  %v3155_v57 = vld [vmem:[%s3460_s0 + $0x78] ss:$48 sps:$4 sm:$0xff]  }
  0x62   :  { %2824 = vmatpush3.bf16.msra.mxu1 %v3102_v58  ;;  %2803 = vmatprep.subr.bf16.mxu0 %v3103_v59  ;;  %v3157_v58 = vld [vmem:[%s3460_s0 + $0x1c] ss:$48 sps:$4 sm:$0xff]  }
  0x63   :  { %2825 = vmatprep.subr.bf16.mxu1 %v3104_v60  ;;  %v3158_v59 = vld [vmem:[%s3460_s0 + $0x7c] ss:$48 sps:$4 sm:$0xff]   ;;  %v202_v60 = vrot.slane %v3153_v56, %v3329_v37 }
  0x64   :  { %v3200_v56 = vld [vmem:[#allocation2 + $0x5b8] sm:$0xff]  }
  0x65   :  { %2804 = vmatpush3.bf16.msra.mxu0 %v3105_v61  ;;  %v216_v61 = vrot.slane %v3155_v57, %v3329_v37 }
  0x66   :  { %2826 = vmatpush3.bf16.msra.mxu1 %v3106_v62  ;;  %2805 = vmatprep.subr.bf16.mxu0 %v3107_v63  ;;  %v3159_v62 = vld [vmem:[#allocation2 + $0x478] sm:$0xff]   ;;  %v209_v63 = vrot.slane %v3157_v58, %v3329_v37 }
  0x67   :  { %2827 = vmatprep.subr.bf16.mxu1 %v3108_v0  ;;  %v223_v0 = vrot.slane %v3158_v59, %v3329_v37  ;;  %v3201_v59 = vld [vmem:[#allocation2 + $0x570] sm:$0xff]  }
  0x69   :  { %2806 = vmatpush3.bf16.msra.mxu0 %v3109_v1  ;;  %v3160_v1 = vld [vmem:[#allocation2 + $0x4f8] sm:$0xff]  }
  0x6a   :  { %2828 = vmatpush3.bf16.msra.mxu1 %v3110_v2  ;;  %2807 = vmatprep.subr.bf16.mxu0 %v3111_v3  ;;  %v225_v2 = vcombine.high %v202_v60, %v216_v61  ;;  %v224_v3 = vcombine.low %v202_v60, %v216_v61 }
  0x6b   :  { %2829 = vmatprep.subr.bf16.mxu1 %v3112_v4  ;;  %v3161_v4 = vld [vmem:[#allocation2 + $0x438] sm:$0xff]  }
  0x6c   :  { %v337_v8 = vpack.c.bf16 %v225_v2, %v225_v2  ;;  %v336_v9 = vpack.c.bf16 %v224_v3, %v224_v3  ;;  %v3206_v2 = vld [vmem:[#allocation2 + $0x5e8] sm:$0xff]  }
  0x6d   :  { %2808 = vmatpush3.bf16.msra.mxu0 %v3113_v5  ;;  %v227_v5 = vcombine.high %v209_v63, %v223_v0  ;;  %v3207_v3 = vld [vmem:[#allocation2 + $0x528] sm:$0xff]  }
  0x6e   :  { %2830 = vmatpush3.bf16.msra.mxu1 %v3114_v6  ;;  %2837 = vmatprep.subr.bf16.mxu0 %v3121_v12  ;;  %v226_v6 = vcombine.low %v209_v63, %v223_v0  ;;  %v3203_v63 = vld [vmem:[#allocation2 + $0x530] sm:$0xff]  }
  0x6f   :  { %2859 = vmatprep.subr.bf16.mxu1 %v3122_v16  ;;  %v339_v11 = vpack.c.bf16 %v227_v5, %v227_v5  ;;  %v3167_v16 = vld [vmem:[#allocation2 + $0x468] sm:$0xff]   ;;  %v3204_v0 = vld [vmem:[#allocation2 + $0x5b0] sm:$0xff]   ;;  %v3209_v5 = vld [vmem:[#allocation2 + $0x560] sm:$0xff]  }
  0x70   :  { %2084 = vmatmul.mubr.bf16.vlgmr.msra.gmra.mxu0 %v332_v25  ;;  %v338_v12 = vpack.c.bf16 %v226_v6, %v226_v6  ;;  %v3176_v25 = vld [vmem:[#allocation2 + $0x4d8] sm:$0xff]   ;;  %v3210_v6 = vld [vmem:[#allocation2 + $0x5e0] sm:$0xff]  }
  0x71   :  { %2124 = vmatmul.mubr.bf16.vlgmr.msra.gmra.mxu1 %v334_v26  ;;  %2838 = vmatpush3.bf16.msra.mxu0 %v3123_v21  ;;  %v3172_v21 = vld [vmem:[#allocation2 + $0x4e0] sm:$0xff]   ;;  %v3177_v26 = vld [vmem:[#allocation2 + $0x418] sm:$0xff]  }
  0x72   :  { %2860 = vmatpush3.bf16.msra.mxu1 %v3124_v22  ;;  %2839 = vmatprep.subr.bf16.mxu0 %v3125_v27  ;;  %v3173_v22 = vld [vmem:[#allocation2 + $0x420] sm:$0xff]   ;;  %v3178_v27 = vld [vmem:[#allocation2 + $0x498] sm:$0xff]  }
  0x73   :  { %2861 = vmatprep.subr.bf16.mxu1 %v3126_v28  ;;  %2163 = vmatprep.mubr.bf16.mxu0 %v337_v8  ;;  %v3179_v28 = vld [vmem:[#allocation2 + $0x450] sm:$0xff]   ;;  %v3212_v8 = vld [vmem:[#allocation2 + $0x5a0] sm:$0xff]  }
  0x74   :  { %2203 = vmatprep.mubr.bf16.mxu1 %v339_v11  ;;  %v3215_v11 = vld [vmem:[#allocation2 + $0x518] sm:$0xff]  }
  0x75   :  { %2840 = vmatpush3.bf16.msra.mxu0 %v3127_v29  ;;  %v3180_v29 = vld [vmem:[#allocation2 + $0x4d0] sm:$0xff]  }
  0x76   :  { %2862 = vmatpush3.bf16.msra.mxu1 %v3128_v30  ;;  %2841 = vmatprep.subr.bf16.mxu0 %v3129_v31  ;;  %v3181_v30 = vld [vmem:[#allocation2 + $0x410] sm:$0xff]  }
  0x77   :  { %2863 = vmatprep.subr.bf16.mxu1 %v3130_v32  ;;  %v3182_v31 = vld [vmem:[#allocation2 + $0x490] sm:$0xff]   ;;  %v3183_v32 = vld [vmem:[#allocation2 + $0x448] sm:$0xff]  }
  0x79   :  { %2842 = vmatpush3.bf16.msra.mxu0 %v3131_v33  ;;  %v3184_v33 = vld [vmem:[#allocation2 + $0x4c8] sm:$0xff]  }
  0x7a   :  { %2864 = vmatpush3.bf16.msra.mxu1 %v3132_v34  ;;  %2843 = vmatprep.subr.bf16.mxu0 %v3133_v35  ;;  %v3185_v34 = vld [vmem:[#allocation2 + $0x408] sm:$0xff]  }
  0x7b   :  { %2865 = vmatprep.subr.bf16.mxu1 %v3134_v36  ;;  %v3186_v35 = vld [vmem:[#allocation2 + $0x488] sm:$0xff]   ;;  %v3187_v36 = vld [vmem:[#allocation2 + $0x440] sm:$0xff]  }
  0x7d   :  { %2844 = vmatpush3.bf16.msra.mxu0 %v3135_v38  ;;  %v3188_v38 = vld [vmem:[#allocation2 + $0x4c0] sm:$0xff]  }
  0x7e   :  { %2866 = vmatpush3.bf16.msra.mxu1 %v3136_v39  ;;  %2845 = vmatprep.subr.bf16.mxu0 %v3137_v40  ;;  %v3189_v39 = vld [vmem:[#allocation2 + $0x400] sm:$0xff]  }
  0x7f   :  { %2867 = vmatprep.subr.bf16.mxu1 %v3138_v41  ;;  %v3190_v40 = vld [vmem:[#allocation2 + $0x480] sm:$0xff]  }
  0x80   :  { %v3191_v41 = vld [vmem:[%s3460_s0 + $0x20] ss:$48 sps:$4 sm:$0xff]  }
  0x81   :  { %2846 = vmatpush3.bf16.msra.mxu0 %v3139_v42  ;;  %v3193_v42 = vld [vmem:[%s3460_s0 + $0x80] ss:$48 sps:$4 sm:$0xff]  }
  0x82   :  { %2868 = vmatpush3.bf16.msra.mxu1 %v3140_v43  ;;  %2847 = vmatprep.subr.bf16.mxu0 %v3141_v44  ;;  %v3195_v43 = vld [vmem:[%s3460_s0 + $0x24] ss:$48 sps:$4 sm:$0xff]  }
  0x83   :  { %2869 = vmatprep.subr.bf16.mxu1 %v3142_v45  ;;  %v3196_v44 = vld [vmem:[%s3460_s0 + $0x84] ss:$48 sps:$4 sm:$0xff]   ;;  %v238_v45 = vrot.slane %v3191_v41, %v3329_v37 }
  0x85   :  { %2848 = vmatpush3.bf16.msra.mxu0 %v3143_v46  ;;  %v252_v46 = vrot.slane %v3193_v42, %v3329_v37 }
  0x86   :  { %2870 = vmatpush3.bf16.msra.mxu1 %v3144_v47  ;;  %2849 = vmatprep.subr.bf16.mxu0 %v3145_v48  ;;  %v245_v47 = vrot.slane %v3195_v43, %v3329_v37  ;;  %v3197_v48 = vld [vmem:[#allocation2 + $0x578] sm:$0xff]  }
  0x87   :  { %2871 = vmatprep.subr.bf16.mxu1 %v3146_v49  ;;  %v259_v49 = vrot.slane %v3196_v44, %v3329_v37 }
  0x89   :  { %2850 = vmatpush3.bf16.msra.mxu0 %v3147_v50  ;;  %v3198_v50 = vld [vmem:[#allocation2 + $0x5f8] sm:$0xff]  }
  0x8a   :  { %2872 = vmatpush3.bf16.msra.mxu1 %v3148_v51  ;;  %2851 = vmatprep.subr.bf16.mxu0 %v3149_v52  ;;  %v261_v51 = vcombine.high %v238_v45, %v252_v46  ;;  %v260_v52 = vcombine.low %v238_v45, %v252_v46 }
  0x8b   :  { %2873 = vmatprep.subr.bf16.mxu1 %v3150_v53  ;;  %v3199_v53 = vld [vmem:[#allocation2 + $0x538] sm:$0xff]  }
  0x8c   :  { %v341_v57 = vpack.c.bf16 %v261_v51, %v261_v51  ;;  %v340_v58 = vpack.c.bf16 %v260_v52, %v260_v52 }
  0x8d   :  { %2852 = vmatpush3.bf16.msra.mxu0 %v3151_v54  ;;  %v263_v54 = vcombine.high %v245_v47, %v259_v49 }
  0x8e   :  { %2874 = vmatpush3.bf16.msra.mxu1 %v3152_v55  ;;  %2881 = vmatprep.subr.bf16.mxu0 %v3159_v62  ;;  %v262_v55 = vcombine.low %v245_v47, %v259_v49  ;;  %v3202_v62 = vld [vmem:[#allocation2 + $0x5f0] sm:$0xff]  }
  0x8f   :  { %2903 = vmatprep.subr.bf16.mxu1 %v3160_v1  ;;  %v343_v60 = vpack.c.bf16 %v263_v54, %v263_v54  ;;  %v3205_v1 = vld [vmem:[#allocation2 + $0x568] sm:$0xff]   ;;  %v3235_v54 = vld [vmem:[%s3463_s3 + $0x38] sm:$0xff]  }
  0x90   :  { %2164 = vmatmul.mubr.bf16.vlgmr.msra.gmra.mxu0 %v336_v9  ;;  %v342_v61 = vpack.c.bf16 %v262_v55, %v262_v55  ;;  %v3213_v9 = vld [vmem:[#allocation2 + $0x558] sm:$0xff]   ;;  %v3291_v55 = vmov 0.0  }
  0x91   :  { %2204 = vmatmul.mubr.bf16.vlgmr.msra.gmra.mxu1 %v338_v12  ;;  %2882 = vmatpush3.bf16.msra.mxu0 %v3161_v4  ;;  %v3208_v4 = vld [vmem:[#allocation2 + $0x5a8] sm:$0xff]   ;;  %v3216_v12 = vld [vmem:[#allocation2 + $0x598] sm:$0xff]  }
  0x92   :  { %2904 = vmatpush3.bf16.msra.mxu1 %v3162_v7  ;;  %2883 = vmatprep.subr.bf16.mxu0 %v3163_v10  ;;  %v3211_v7 = vld [vmem:[#allocation2 + $0x520] sm:$0xff]   ;;  %v3214_v10 = vld [vmem:[#allocation2 + $0x5d8] sm:$0xff]  }
  0x93   :  { %2905 = vmatprep.subr.bf16.mxu1 %v3164_v13  ;;  %2243 = vmatprep.mubr.bf16.mxu0 %v341_v57  ;;  %v3217_v13 = vld [vmem:[#allocation2 + $0x550] sm:$0xff]   ;;  %v3237_v57 = vld [vmem:[%s3463_s3 + $0x28] sm:$0xff]  }
  0x94   :  { %2283 = vmatprep.mubr.bf16.mxu1 %v343_v60 }
  0x95   :  { %2884 = vmatpush3.bf16.msra.mxu0 %v3165_v14  ;;  %v3218_v14 = vld [vmem:[#allocation2 + $0x5d0] sm:$0xff]  }
  0x96   :  { %2906 = vmatpush3.bf16.msra.mxu1 %v3166_v15  ;;  %2885 = vmatprep.subr.bf16.mxu0 %v3167_v16  ;;  %v3219_v15 = vld [vmem:[#allocation2 + $0x510] sm:$0xff]  }
  0x97   :  { %2907 = vmatprep.subr.bf16.mxu1 %v3168_v17  ;;  %v3220_v16 = vld [vmem:[#allocation2 + $0x590] sm:$0xff]   ;;  %v3221_v17 = vld [vmem:[#allocation2 + $0x548] sm:$0xff]  }
  0x99   :  { %2886 = vmatpush3.bf16.msra.mxu0 %v3169_v18  ;;  %v3222_v18 = vld [vmem:[#allocation2 + $0x5c8] sm:$0xff]  }
  0x9a   :  { %2908 = vmatpush3.bf16.msra.mxu1 %v3170_v19  ;;  %2887 = vmatprep.subr.bf16.mxu0 %v3171_v20  ;;  %v3223_v19 = vld [vmem:[#allocation2 + $0x508] sm:$0xff]  }
  0x9b   :  { %2909 = vmatprep.subr.bf16.mxu1 %v3172_v21  ;;  %v3224_v20 = vld [vmem:[#allocation2 + $0x588] sm:$0xff]   ;;  %v3225_v21 = vld [vmem:[#allocation2 + $0x540] sm:$0xff]  }
  0x9d   :  { %2888 = vmatpush3.bf16.msra.mxu0 %v3173_v22  ;;  %v3226_v22 = vld [vmem:[#allocation2 + $0x5c0] sm:$0xff]  }
  0x9e   :  { %2910 = vmatpush3.bf16.msra.mxu1 %v3174_v23  ;;  %2889 = vmatprep.subr.bf16.mxu0 %v3175_v24  ;;  %v3227_v23 = vld [vmem:[#allocation2 + $0x500] sm:$0xff]  }
  0x9f   :  { %2911 = vmatprep.subr.bf16.mxu1 %v3176_v25  ;;  %v3228_v24 = vld [vmem:[#allocation2 + $0x580] sm:$0xff]   ;;  %v3229_v25 = vld [vmem:[%s3460_s0 + $0x28] ss:$48 sps:$4 sm:$0xff]  }
  0xa1   :  { %2890 = vmatpush3.bf16.msra.mxu0 %v3177_v26  ;;  %v3231_v26 = vld [vmem:[%s3460_s0 + $0x88] ss:$48 sps:$4 sm:$0xff]  }
  0xa2   :  { %2912 = vmatpush3.bf16.msra.mxu1 %v3178_v27  ;;  %2891 = vmatprep.subr.bf16.mxu0 %v3179_v28  ;;  %v3233_v27 = vld [vmem:[%s3460_s0 + $0x2c] ss:$48 sps:$4 sm:$0xff]  }
  0xa3   :  { %2913 = vmatprep.subr.bf16.mxu1 %v3180_v29  ;;  %v3234_v28 = vld [vmem:[%s3460_s0 + $0x8c] ss:$48 sps:$4 sm:$0xff]   ;;  %v274_v29 = vrot.slane %v3229_v25, %v3329_v37 }
  0xa5   :  { %2892 = vmatpush3.bf16.msra.mxu0 %v3181_v30  ;;  %v288_v30 = vrot.slane %v3231_v26, %v3329_v37 }
  0xa6   :  { %2914 = vmatpush3.bf16.msra.mxu1 %v3182_v31  ;;  %2893 = vmatprep.subr.bf16.mxu0 %v3183_v32  ;;  %v281_v31 = vrot.slane %v3233_v27, %v3329_v37  ;;  %v295_v32 = vrot.slane %v3234_v28, %v3329_v37  ;;  %v2503_v37 = vld [vmem:[%s3462_s2] ss:$0 sm:$0xff] }
  0xa7   :  { %2915 = vmatprep.subr.bf16.mxu1 %v3184_v33  ;;  %v297_v33 = vcombine.high %v274_v29, %v288_v30 }
  0xa9   :  { %2894 = vmatpush3.bf16.msra.mxu0 %v3185_v34  ;;  %v299_v34 = vcombine.high %v281_v31, %v295_v32 }
  0xaa   :  { %2916 = vmatpush3.bf16.msra.mxu1 %v3186_v35  ;;  %2895 = vmatprep.subr.bf16.mxu0 %v3187_v36  ;;  %v296_v35 = vcombine.low %v274_v29, %v288_v30  ;;  %v298_v36 = vcombine.low %v281_v31, %v295_v32 }
  0xab   :  { %2917 = vmatprep.subr.bf16.mxu1 %v3188_v38  ;;  %v345_v38 = vpack.c.bf16 %v297_v33, %v297_v33 }
  0xac   :  { %v346_v41 = vpack.c.bf16 %v298_v36, %v298_v36 }
  0xad   :  { %2896 = vmatpush3.bf16.msra.mxu0 %v3189_v39  ;;  %v347_v39 = vpack.c.bf16 %v299_v34, %v299_v34 }
  0xae   :  { %2918 = vmatpush3.bf16.msra.mxu1 %v3190_v40  ;;  %2925 = vmatprep.subr.bf16.mxu0 %v3197_v48  ;;  %v344_v40 = vpack.c.bf16 %v296_v35, %v296_v35 }
  0xaf   :  { %2947 = vmatprep.subr.bf16.mxu1 %v3198_v50 }
  0xb0   :  { %2244 = vmatmul.mubr.bf16.vlgmr.msra.gmra.mxu0 %v340_v58  ;;  %v3238_v58 = vld [vmem:[%s3463_s3 + $0x20] sm:$0xff]  }
  0xb1   :  { %2284 = vmatmul.mubr.bf16.vlgmr.msra.gmra.mxu1 %v342_v61  ;;  %2926 = vmatpush3.bf16.msra.mxu0 %v3199_v53 }
  0xb2   :  { %2948 = vmatpush3.bf16.msra.mxu1 %v3200_v56  ;;  %2927 = vmatprep.subr.bf16.mxu0 %v3201_v59  ;;  %v3236_v56 = vld [vmem:[%s3463_s3 + $0x30] sm:$0xff]   ;;  %v3239_v59 = vld [vmem:[%s3463_s3 + $0x18] sm:$0xff]  }
  0xb3   :  { %2949 = vmatprep.subr.bf16.mxu1 %v3202_v62  ;;  %2323 = vmatprep.mubr.bf16.mxu0 %v345_v38 }
  0xb4   :  { %2363 = vmatprep.mubr.bf16.mxu1 %v347_v39 }
  0xb5   :  { %2928 = vmatpush3.bf16.msra.mxu0 %v3203_v63 }
  0xb6   :  { %2950 = vmatpush3.bf16.msra.mxu1 %v3204_v0  ;;  %2929 = vmatprep.subr.bf16.mxu0 %v3205_v1 }
  0xb7   :  { %2951 = vmatprep.subr.bf16.mxu1 %v3206_v2 }
  0xb9   :  { %2930 = vmatpush3.bf16.msra.mxu0 %v3207_v3 }
  0xba   :  { %2952 = vmatpush3.bf16.msra.mxu1 %v3208_v4  ;;  %2931 = vmatprep.subr.bf16.mxu0 %v3209_v5 }
  0xbb   :  { %2953 = vmatprep.subr.bf16.mxu1 %v3210_v6 }
  0xbd   :  { %2932 = vmatpush3.bf16.msra.mxu0 %v3211_v7 }
  0xbe   :  { %2954 = vmatpush3.bf16.msra.mxu1 %v3212_v8  ;;  %2933 = vmatprep.subr.bf16.mxu0 %v3213_v9  ;;  %v3240_v8 = vld [vmem:[%s3463_s3 + $0x10] sm:$0xff]   ;;  %v3241_v9 = vld [vmem:[%s3463_s3 + $0x8] sm:$0xff]  }
  0xbf   :  { %2955 = vmatprep.subr.bf16.mxu1 %v3214_v10  ;;  %v3242_v10 = vld [vmem:[%s3463_s3] sm:$0xff]  }
  0xc1   :  { %2934 = vmatpush3.bf16.msra.mxu0 %v3215_v11 }
  0xc2   :  { %2956 = vmatpush3.bf16.msra.mxu1 %v3216_v12  ;;  %2935 = vmatprep.subr.bf16.mxu0 %v3217_v13 }
  0xc3   :  { %2957 = vmatprep.subr.bf16.mxu1 %v3218_v14 }
  0xc5   :  { %2936 = vmatpush3.bf16.msra.mxu0 %v3219_v15 }
  0xc6   :  { %2958 = vmatpush3.bf16.msra.mxu1 %v3220_v16  ;;  %2937 = vmatprep.subr.bf16.mxu0 %v3221_v17 }
  0xc7   :  { %2959 = vmatprep.subr.bf16.mxu1 %v3222_v18 }
  0xc9   :  { %2938 = vmatpush3.bf16.msra.mxu0 %v3223_v19 }
  0xca   :  { %2960 = vmatpush3.bf16.msra.mxu1 %v3224_v20  ;;  %2939 = vmatprep.subr.bf16.mxu0 %v3225_v21 }
  0xcb   :  { %2961 = vmatprep.subr.bf16.mxu1 %v3226_v22 }
  0xcd   :  { %2940 = vmatpush3.bf16.msra.mxu0 %v3227_v23 }
  0xce   :  { %2962 = vmatpush3.bf16.msra.mxu1 %v3228_v24  ;;  %2978 = vmatprep.subr.bf16.mxu0 %v3291_v55 }
  0xd0   :  { %2324 = vmatmul.mubr.bf16.vlgmr.msra.gmra.mxu0 %v344_v40 }
  0xd1   :  { %2364 = vmatmul.mubr.bf16.vlgmr.msra.gmra.mxu1 %v346_v41  ;;  %2979 = vmatpush3.bf16.msra.mxu0 %v3235_v54 }
  0xd2   :  { %2980 = vmatprep.subr.bf16.mxu0 %v3291_v55  ;;  %2994 = vmatprep.mubr.msk.bf16.mxu0 %vm3292_vm0, %v3291_v55 }
  0xd5   :  { %2981 = vmatpush3.bf16.msra.mxu0 %v3236_v56 }
  0xd6   :  { %2982 = vmatprep.subr.bf16.mxu0 %v3291_v55 }
  0xd9   :  { %2983 = vmatpush3.bf16.msra.mxu0 %v3237_v57 }
  0xda   :  { %2984 = vmatprep.subr.bf16.mxu0 %v3291_v55 }
  0xdd   :  { %2985 = vmatpush3.bf16.msra.mxu0 %v3238_v58 }
  0xde   :  { %2986 = vmatprep.subr.bf16.mxu0 %v3291_v55 }
  0xe1   :  { %2987 = vmatpush3.bf16.msra.mxu0 %v3239_v59 }
  0xe2   :  { %2988 = vmatprep.subr.bf16.mxu0 %v3291_v55 }
  0xe5   :  { %2989 = vmatpush3.bf16.msra.mxu0 %v3240_v8 }
  0xe6   :  { %2990 = vmatprep.subr.bf16.mxu0 %v3291_v55 }
  0xe9   :  { %2991 = vmatpush3.bf16.msra.mxu0 %v3241_v9 }
  0xea   :  { %2992 = vmatprep.subr.bf16.mxu0 %v3291_v55 }
  0xed   :  { %2993 = vmatpush3.bf16.msra.mxu0 %v3242_v10 }
  0xf0   :  { %v2721_v42 = vpop.f32.mrf.mxu0 }
  0xf1   :  { %v2743_v43 = vpop.f32.mrf.mxu1 }
  0xf2   :  { %v2722_v44 = vpop.f32.mrf.mxu0 }
  0xf3   :  { %v2723_v45 = vadd.f32 %v2722_v44, %v2721_v42  ;;  %v2744_v46 = vpop.f32.mrf.mxu1 }
  0xf4   :  { %v2745_v47 = vadd.f32 %v2744_v46, %v2743_v43  ;;  %v2724_v48 = vpop.f32.mrf.mxu0 }
  0xf5   :  { %v1926_v49 = vadd.f32 %v2723_v45, %v2503_v37  ;;  %v2746_v50 = vpop.f32.mrf.mxu1 }
  0xf6   :  { %v2725_v51 = vpop.f32.mrf.mxu0 }
  0xf7   :  { %v1966_v52 = vadd.f32 %v2745_v47, %v1926_v49  ;;  %v2747_v53 = vpop.f32.mrf.mxu1 }
 0x110   :  { %v2765_v60 = vpop.f32.mrf.mxu0 }
 0x111   :  { %v2787_v61 = vpop.f32.mrf.mxu1 }
 0x112   :  { %v2766_v62 = vpop.f32.mrf.mxu0 }
 0x113   :  { %v2767_v63 = vadd.f32 %v2766_v62, %v2765_v60  ;;  %v2788_v0 = vpop.f32.mrf.mxu1 }
 0x114   :  { %v2789_v1 = vadd.f32 %v2788_v0, %v2787_v61  ;;  %v2768_v2 = vpop.f32.mrf.mxu0  ;;  %v2696_v61 = vld [vmem:[%s3464_s4] ss:$0 sm:$0xff] }
 0x115   :  { %v2006_v3 = vadd.f32 %v2767_v63, %v1966_v52  ;;  %v2790_v4 = vpop.f32.mrf.mxu1 }
 0x116   :  { %v2769_v5 = vpop.f32.mrf.mxu0 }
 0x117   :  { %v2046_v6 = vadd.f32 %v2789_v1, %v2006_v3  ;;  %v2791_v7 = vpop.f32.mrf.mxu1 }
 0x130   :  { %v2809_v11 = vpop.f32.mrf.mxu0 }
 0x131   :  { %v2831_v12 = vpop.f32.mrf.mxu1 }
 0x132   :  { %v2810_v13 = vpop.f32.mrf.mxu0 }
 0x133   :  { %v2832_v14 = vpop.f32.mrf.mxu1  ;;  %v2811_v15 = vadd.f32 %v2810_v13, %v2809_v11 }
 0x134   :  { %v2833_v16 = vadd.f32 %v2832_v14, %v2831_v12  ;;  %v2812_v17 = vpop.f32.mrf.mxu0 }
 0x135   :  { %v2834_v18 = vpop.f32.mrf.mxu1  ;;  %v2086_v19 = vadd.f32 %v2811_v15, %v2046_v6 }
 0x136   :  { %v2813_v20 = vpop.f32.mrf.mxu0 }
 0x137   :  { %v2835_v21 = vpop.f32.mrf.mxu1  ;;  %v2126_v22 = vadd.f32 %v2833_v16, %v2086_v19 }
 0x150   :  { %v2853_v23 = vpop.f32.mrf.mxu0 }
 0x151   :  { %v2875_v24 = vpop.f32.mrf.mxu1 }
 0x152   :  { %v2854_v25 = vpop.f32.mrf.mxu0 }
 0x153   :  { %v2855_v26 = vadd.f32 %v2854_v25, %v2853_v23  ;;  %v2876_v27 = vpop.f32.mrf.mxu1 }
 0x154   :  { %v2877_v28 = vadd.f32 %v2876_v27, %v2875_v24  ;;  %v2856_v29 = vpop.f32.mrf.mxu0 }
 0x155   :  { %v2166_v30 = vadd.f32 %v2855_v26, %v2126_v22  ;;  %v2878_v31 = vpop.f32.mrf.mxu1 }
 0x156   :  { %v2857_v32 = vpop.f32.mrf.mxu0 }
 0x157   :  { %v2206_v33 = vadd.f32 %v2877_v28, %v2166_v30  ;;  %v2879_v34 = vpop.f32.mrf.mxu1 }
 0x170   :  { %v2897_v35 = vpop.f32.mrf.mxu0 }
 0x171   :  { %v2919_v36 = vpop.f32.mrf.mxu1 }
 0x172   :  { %v2898_v38 = vpop.f32.mrf.mxu0 }
 0x173   :  { %v2920_v39 = vpop.f32.mrf.mxu1  ;;  %v2899_v37 = vadd.f32 %v2898_v38, %v2897_v35 }
 0x174   :  { %v2900_v40 = vpop.f32.mrf.mxu0  ;;  %v2921_v45 = vadd.f32 %v2920_v39, %v2919_v36 }
 0x175   :  { %v2922_v41 = vpop.f32.mrf.mxu1  ;;  %v2246_v44 = vadd.f32 %v2899_v37, %v2206_v33 }
 0x176   :  { %v2901_v42 = vpop.f32.mrf.mxu0 }
 0x177   :  { %v2923_v43 = vpop.f32.mrf.mxu1  ;;  %v2286_v50 = vadd.f32 %v2921_v45, %v2246_v44 }
 0x190   :  { %v2941_v46 = vpop.f32.mrf.mxu0 }
 0x191   :  { %v2963_v47 = vpop.f32.mrf.mxu1 }
 0x192   :  { %v2942_v48 = vpop.f32.mrf.mxu0 }
 0x193   :  { %v2964_v49 = vpop.f32.mrf.mxu1  ;;  %v2943_v51 = vadd.f32 %v2942_v48, %v2941_v46 }
 0x194   :  { %v2944_v52 = vpop.f32.mrf.mxu0  ;;  %v2965_v55 = vadd.f32 %v2964_v49, %v2963_v47 }
 0x195   :  { %v2966_v53 = vpop.f32.mrf.mxu1  ;;  %v2326_v54 = vadd.f32 %v2943_v51, %v2286_v50 }
 0x196   :  { %v2945_v56 = vpop.f32.mrf.mxu0 }
 0x197   :  { %v2967_v57 = vpop.f32.mrf.mxu1  ;;  %v2366_v58 = vadd.f32 %v2965_v55, %v2326_v54 }
 0x199   :  { %v2371_v59 = vmax.f32 %v2366_v58, 0.0 }
 0x19b   :  { %v2372_v60 = vpack.c.bf16 %v2371_v59, %v2371_v59 }
 0x19d   :  { %2995 = vmatmul.mubr.bf16.vlgmr.msra.gmra.mxu0 %v2372_v60 }
 0x25d   :  { %v2478_v62 = vpop.f32.mrf.mxu0 }
 0x25e   :  { %v2479_v63 = vadd.f32 %v2696_v61, %v2478_v62 }
 0x25f   :  { %v2996_v0 = vpop.f32.mrf.mxu0 }
 0x260   :  { %v2484_v1 = vmax.f32 %v2479_v63, 0.0 }
 0x261   :  { %v2481_v2 = vpop.f32.mrf.mxu0 }
 0x262   :  { %2485 = vst [vmem:[#allocation5] sm:$0xff] %v2484_v1 }
 0x263   :  { %v2997_v3 = vpop.f32.mrf.mxu0 }
 0x264   :  { %2490 = vsyncadd [#allocation4], 96  ;;  %s3293_s12 = smov [#allocation5]  }
 0x265   :  { %s2491_s13 = sshll.u32 %s3293_s12, 4  ;;  %s2492_s13 = int_to_ptr.vmem [resolvable:$true] %s2491_s13 }
 0x266   :  { %s3263_s14 = scalar_lea.vmem %s2492_s13, 32  ;;  %s3267_s15 = scalar_lea.vmem %s2492_s13, 128 }
 0x267   :  { %p3264_p5 = scmp.ne.s32.totalorder %s2492_s13, %s3263_s14  ;;  %p3268_p6 = scmp.lt.s32.totalorder %s2492_s13, %s2492_s13 }
 0x268   :  { %p3269_p7 = scmp.lt.s32.totalorder %s3267_s15, %s3263_s14 }
 0x26a   :  { %p3270_p8 = por %p3269_p7, %p3268_p6 }
 0x26c   :  { %p3271_p9 = pnand %p3270_p8, %p3264_p5 }
 0x26e   :  { %3274 = shalt.err (!%p3271_p9)
}
 0x26f   :  { %s3294_s4 = smov 32   ;;  %s3295_s16 = smov 2  }
 0x270   :  { %2497 = dma.vmem_to_hbm [thread:$0]  %s2492_s13, 32, %s3465_s5, [#allocation4], %s3294_s4, %s3294_s4, %s3295_s16  }
 0x271   :  { %3285 = dma.done.wait [#allocation4], 128  }
 0x272   :  { %3286 = vsyncadd [#allocation4], 4294967168 }
 0x273   :  { %2501 = vsyncpa [#allocation3], 1 }
 0x274   :  { %2502 = vsyncpa [#allocation4], 1 }

</bundles_post_ra>
